<compile_context>
chip_gen: v6e
topology: v6e:2x2x1
jax: 0.10.0
libtpu: 0.0.40
codegen_flags: <defaults>
</compile_context>

<pallas_src>
import functools

import numpy as np
import jax
import jax.numpy as jnp
from jax import lax
from jax.experimental import pallas as pl
from jax.experimental.pallas import tpu as pltpu

_R = 128       # original rows folded per output row (keeps the lane dim a multiple of 128)
_MIN_TQ = 32   # int8 output blocks need a (32, 128) minimum tile


def _split_distance_kernel(w1_ref, e_ref, x_ref, o_ref, *, n_emb, splits):
    """One grid step over `tq` folded rows (= tq * 128 original rows).

    w1_ref: (2*_R, _R)      bf16 constant, column r: +1 at row 2r+1, -1 at row 2r
    e_ref : (_R, _R*n_emb)  bf16 constant, row r: 1 at columns n_emb*r + k
    x_ref : (tq, 2*_R)      int32 (or f32) folded coordinates, x[q, 2r+c] = coords[128q+r, c]
    o_ref : (tq, _R*n_emb)  int8 folded one-hot output
    """
    wn = o_ref.shape[-1]

    # In-kernel cast (VPU); the int32 input streams straight from HBM.
    xf = x_ref[...].astype(jnp.float32)              # exact for |coord| < 2**24

    # Exact 3-way bf16 split: xf == hi + mid + lo for every f32 value.
    hi = xf.astype(jnp.bfloat16)
    r1 = xf - hi.astype(jnp.float32)
    mid = r1.astype(jnp.bfloat16)
    lo = (r1 - mid.astype(jnp.float32)).astype(jnp.bfloat16)

    # delta[q, r] = coords[128q+r, 1] - coords[128q+r, 0] via three single-pass bf16
    # MXU matmuls (W1 entries are 0/+1/-1, exact in bf16), accumulated in f32.
    w1 = w1_ref[...]
    delta = jnp.dot(hi, w1, preferred_element_type=jnp.float32)
    delta = delta + jnp.dot(mid, w1, preferred_element_type=jnp.float32)
    delta = delta + jnp.dot(lo, w1, preferred_element_type=jnp.float32)

    # searchsorted(splits, delta, side='left'): bucket = #{s : s < delta}.
    bucket = jnp.zeros_like(delta)
    for s in splits:
        bucket = bucket + jnp.where(delta > jnp.float32(s), 1.0, 0.0)

    # Deinterleave rows into lanes: bucket_exp[q, n_emb*r + k] = bucket[q, r] via one
    # single-pass bf16 matmul (bucket values 0..n_splits are exact in bf16).
    bucket_exp = jnp.dot(bucket.astype(jnp.bfloat16), e_ref[...],
                         preferred_element_type=jnp.float32)

    # One-hot: lane n_emb*r + k is hot iff bucket[q, r] == k.  Single lane-dense,
    # full-width int8 store.
    k_col = (lax.broadcasted_iota(jnp.int32, (1, wn), 1) % n_emb).astype(jnp.float32)
    hot = bucket_exp == k_col
    o_ref[...] = jnp.where(hot, 1.0, 0.0).astype(jnp.int8)


def _build_w1():
    # Pair-difference matrix: column r computes coords[...,1] - coords[...,0] of pair r.
    w = np.zeros((2 * _R, _R), np.float32)
    r = np.arange(_R)
    w[2 * r + 1, r] = 1.0
    w[2 * r, r] = -1.0
    return jnp.asarray(w, dtype=jnp.bfloat16)            # +-1 is exact in bf16


def _build_expand(n_emb):
    # Row->lane replication: folded row value r broadcasts to output lanes n_emb*r + k.
    e = np.zeros((_R, _R * n_emb), np.float32)
    r = np.arange(_R)
    for k in range(n_emb):
        e[r, n_emb * r + k] = 1.0
    return jnp.asarray(e, dtype=jnp.bfloat16)             # 0/1 is exact in bf16


def _pick_tq(nq, tq_default):
    """Row tile over folded rows: a multiple of 32 (int8 min tile) giving >= 4 grid
    steps when the problem is big enough (2 per TensorCore on v7x), else >= 2 steps,
    else a single full-array block (always layout-legal)."""
    if nq < 2 * _MIN_TQ:
        return nq
    target_steps = 4 if nq >= 4 * _MIN_TQ else 2
    tq = min(tq_default, (nq // target_steps) // _MIN_TQ * _MIN_TQ)
    return max(_MIN_TQ, tq)


@functools.partial(jax.jit, static_argnames=("splits", "tq"))
def _split_distance_encoding_jit(coordinates, splits, tq):
    assert coordinates.ndim == 2 and coordinates.shape[-1] == 2, coordinates.shape
    n_emb = len(splits) + 1
    wn = _R * n_emb
    n = coordinates.shape[0]
    if n == 0:
        return jnp.zeros((0, n_emb), jnp.int8)

    x = coordinates
    if not (x.dtype == np.int32 or x.dtype == np.float32):
        x = x.astype(jnp.int32)          # only non-{int32,f32} inputs pay a cast pass

    nq = (n + _R - 1) // _R              # number of folded rows
    n_pad = nq * _R - n
    if n_pad:
        # TODO(synk): the ragged-N path still costs one extra HBM pass (jnp.pad copies
        # the whole input); callers that can should pass N as a multiple of 128.
        x = jnp.pad(x, ((0, n_pad), (0, 0)))
    xf = x.reshape(nq, 2 * _R)           # free reshape: xf[q, 2r + c] = coords[128q + r, c]

    tq_eff = _pick_tq(nq, tq)
    grid = ((nq + tq_eff - 1) // tq_eff,)  # ragged last block -> Pallas write-masking

    w1 = _build_w1()
    e = _build_expand(n_emb)
    kernel = functools.partial(_split_distance_kernel, n_emb=n_emb, splits=splits)

    out = pl.pallas_call(
        kernel,
        out_shape=jax.ShapeDtypeStruct((nq, wn), jnp.int8),
        grid_spec=pltpu.PrefetchScalarGridSpec(
            num_scalar_prefetch=0,
            grid=grid,
            in_specs=[
                # Constant operands: block index never changes, so the pipeline keeps
                # them resident in VMEM (no re-DMA per step).
                pl.BlockSpec((2 * _R, _R), lambda i: (0, 0)),
                pl.BlockSpec((_R, wn), lambda i: (0, 0)),
                pl.BlockSpec((tq_eff, 2 * _R), lambda i: (i, 0)),
            ],
            out_specs=pl.BlockSpec((tq_eff, wn), lambda i: (i, 0)),
        ),
        compiler_params=pltpu.CompilerParams(
            dimension_semantics=("parallel",),
        ),
    )(w1, e, xf)

    out = out.reshape(nq * _R, n_emb)    # free reshape back to one row per input row
    if n_pad:
        out = out[:n]                    # fuses into the consumer under jit
    return out


def split_distance_encoding(coordinates, splits=(60, 170), *, tq=1024):
    """Pallas TPU implementation of SplitDistanceEncoding.forward.

    coordinates: (N, 2) integer (or float32) array
    returns:     (N, len(splits)+1) int8 one-hot of searchsorted(splits, c1 - c0)
    """
    splits = tuple(float(s) for s in splits)
    return _split_distance_encoding_jit(jnp.asarray(coordinates), splits, int(tq))


if __name__ == "__main__":
    splits = (60, 170)
    n_emb = len(splits) + 1

    key = jax.random.PRNGKey(0)
    base = jax.random.randint(key, (1048, 2), -300, 300, dtype=jnp.int32)

    big = 2 ** 24 - 216   # large-magnitude coordinates, still |coord| < 2**24
    edge = jnp.array(
        [[0, 59], [0, 60], [0, 61], [0, 169], [0, 170], [0, 171],
         [12345, 12345 + 60], [12345, 12345 + 61],
         [20000, 20000 + 170], [20000, 20000 + 171],
         [-50, 10], [100, -100],
         # boundary deltas on near-2**24 and mixed-sign bases (exactness of the
         # chunked bf16 matmul near the split thresholds)
         [big, big + 60], [big, big + 61], [big, big + 170], [big, big + 171],
         [-big, -big + 170], [-big, -big + 171],
         [-(2 ** 23), 2 ** 23 - 1]],
        dtype=jnp.int32,
    )
    coordinates = jnp.concatenate([base, edge], axis=0)   # N = 1067 (ragged-tail path)

    def reference(coords):
        delta = coords[:, 1] - coords[:, 0]
        bucket = jnp.searchsorted(jnp.asarray(splits, dtype=delta.dtype), delta,
                                  side="left")
        return jax.nn.one_hot(bucket, n_emb, dtype=jnp.int32)

    out = jax.block_until_ready(split_distance_encoding(coordinates, splits))
    assert out.shape == (coordinates.shape[0], n_emb), out.shape
    assert out.dtype == np.int8, out.dtype
    np.testing.assert_array_equal(np.asarray(out), np.asarray(reference(coordinates)))

    # Aligned, multi-block path (N % 128 == 0, several 32-row int8 tiles, no pad).
    coords2 = jnp.concatenate([coordinates] * 8, axis=0)[: 64 * _R]
    out2 = jax.block_until_ready(split_distance_encoding(coords2, splits))
    assert out2.shape == (coords2.shape[0], n_emb), out2.shape
    np.testing.assert_array_equal(np.asarray(out2), np.asarray(reference(coords2)))

    print("KERNEL_OK")
</pallas_src>

<mosaic_0001>
module attributes {stable_mosaic.version = 11 : i64} {
  func.func @_split_distance_kernel(%arg0: i32, %arg1: memref<256x128xbf16, #tpu.memory_space<vmem>>, %arg2: memref<128x384xbf16, #tpu.memory_space<vmem>>, %arg3: memref<9x256xi32, #tpu.memory_space<vmem>>, %arg4: memref<9x384xi8, #tpu.memory_space<vmem>>) attributes {dimension_semantics = [#tpu.dimension_semantics<parallel>], iteration_bounds = array<i64: 1>, scalar_prefetch = 0 : i64, scratch_operands = 0 : i64, tpu.core_type = #tpu.core_type<tc>, window_params = [{pipeline_mode = #tpu.pipeline_mode<synchronous>, transform_indices = @transform_0, window_bounds = array<i64: 256, 128>}, {pipeline_mode = #tpu.pipeline_mode<synchronous>, transform_indices = @transform_1, window_bounds = array<i64: 128, 384>}, {transform_indices = @transform_2, window_bounds = array<i64: 9, 256>}, {transform_indices = @transform_3, window_bounds = array<i64: 9, 384>}]} {
    %c0 = arith.constant 0 : index
    %c0_0 = arith.constant 0 : index
    %0 = vector.load %arg3[%c0, %c0_0] : memref<9x256xi32, #tpu.memory_space<vmem>>, vector<9x256xi32>
    %1 = arith.sitofp %0 : vector<9x256xi32> to vector<9x256xf32>
    %2 = arith.truncf %1 : vector<9x256xf32> to vector<9x256xbf16>
    %3 = arith.extf %2 : vector<9x256xbf16> to vector<9x256xf32>
    %4 = arith.subf %1, %3 : vector<9x256xf32>
    %5 = arith.truncf %4 : vector<9x256xf32> to vector<9x256xbf16>
    %6 = arith.extf %5 : vector<9x256xbf16> to vector<9x256xf32>
    %7 = arith.subf %4, %6 : vector<9x256xf32>
    %8 = arith.truncf %7 : vector<9x256xf32> to vector<9x256xbf16>
    %c0_1 = arith.constant 0 : index
    %c0_2 = arith.constant 0 : index
    %9 = vector.load %arg1[%c0_1, %c0_2] : memref<256x128xbf16, #tpu.memory_space<vmem>>, vector<256x128xbf16>
    %cst = arith.constant dense<0.000000e+00> : vector<9x128xf32>
    %10 = tpu.matmul %2, %9, %cst {dimension_numbers = #tpu.dot_dimension_numbers<[1], [0], [0], [1], [0, 0, 1, 1], [], []>} : vector<9x256xbf16>, vector<256x128xbf16>, vector<9x128xf32> -> vector<9x128xf32>
    %cst_3 = arith.constant dense<0.000000e+00> : vector<9x128xf32>
    %11 = tpu.matmul %5, %9, %cst_3 {dimension_numbers = #tpu.dot_dimension_numbers<[1], [0], [0], [1], [0, 0, 1, 1], [], []>} : vector<9x256xbf16>, vector<256x128xbf16>, vector<9x128xf32> -> vector<9x128xf32>
    %12 = arith.addf %10, %11 : vector<9x128xf32>
    %cst_4 = arith.constant dense<0.000000e+00> : vector<9x128xf32>
    %13 = tpu.matmul %8, %9, %cst_4 {dimension_numbers = #tpu.dot_dimension_numbers<[1], [0], [0], [1], [0, 0, 1, 1], [], []>} : vector<9x256xbf16>, vector<256x128xbf16>, vector<9x128xf32> -> vector<9x128xf32>
    %14 = arith.addf %12, %13 : vector<9x128xf32>
    %cst_5 = arith.constant 0.000000e+00 : f32
    %15 = vector.broadcast %cst_5 : f32 to vector<9x128xf32>
    %cst_6 = arith.constant 6.000000e+01 : f32
    %16 = vector.broadcast %cst_6 : f32 to vector<9x128xf32>
    %17 = arith.cmpf ogt, %14, %16 : vector<9x128xf32>
    %cst_7 = arith.constant 1.000000e+00 : f32
    %cst_8 = arith.constant 0.000000e+00 : f32
    %18 = vector.broadcast %cst_7 : f32 to vector<9x128xf32>
    %19 = vector.broadcast %cst_8 : f32 to vector<9x128xf32>
    %20 = arith.select %17, %18, %19 : vector<9x128xi1>, vector<9x128xf32>
    %21 = arith.addf %15, %20 : vector<9x128xf32>
    %cst_9 = arith.constant 1.700000e+02 : f32
    %22 = vector.broadcast %cst_9 : f32 to vector<9x128xf32>
    %23 = arith.cmpf ogt, %14, %22 : vector<9x128xf32>
    %cst_10 = arith.constant 1.000000e+00 : f32
    %cst_11 = arith.constant 0.000000e+00 : f32
    %24 = vector.broadcast %cst_10 : f32 to vector<9x128xf32>
    %25 = vector.broadcast %cst_11 : f32 to vector<9x128xf32>
    %26 = arith.select %23, %24, %25 : vector<9x128xi1>, vector<9x128xf32>
    %27 = arith.addf %21, %26 : vector<9x128xf32>
    %28 = arith.truncf %27 : vector<9x128xf32> to vector<9x128xbf16>
    %c0_12 = arith.constant 0 : index
    %c0_13 = arith.constant 0 : index
    %29 = vector.load %arg2[%c0_12, %c0_13] : memref<128x384xbf16, #tpu.memory_space<vmem>>, vector<128x384xbf16>
    %cst_14 = arith.constant dense<0.000000e+00> : vector<9x384xf32>
    %30 = tpu.matmul %28, %29, %cst_14 {dimension_numbers = #tpu.dot_dimension_numbers<[1], [0], [0], [1], [0, 0, 1, 1], [], []>} : vector<9x128xbf16>, vector<128x384xbf16>, vector<9x384xf32> -> vector<9x384xf32>
    %31 = tpu.iota {dimensions = array<i32: 1>} : vector<1x384xi32>
    %c3_i32 = arith.constant 3 : i32
    %c0_i32 = arith.constant 0 : i32
    %32 = arith.cmpi eq, %c3_i32, %c0_i32 : i32
    %c1_i32 = arith.constant 1 : i32
    %33 = arith.select %32, %c1_i32, %c3_i32 : i32
    %34 = vector.broadcast %33 : i32 to vector<1x384xi32>
    %35 = arith.remsi %31, %34 : vector<1x384xi32>
    %c0_i32_15 = arith.constant 0 : i32
    %36 = vector.broadcast %c0_i32_15 : i32 to vector<1x384xi32>
    %37 = arith.cmpi ne, %35, %36 : vector<1x384xi32>
    %c0_i32_16 = arith.constant 0 : i32
    %38 = vector.broadcast %c0_i32_16 : i32 to vector<1x384xi32>
    %39 = arith.cmpi slt, %35, %38 : vector<1x384xi32>
    %c0_i32_17 = arith.constant 0 : i32
    %40 = arith.cmpi slt, %33, %c0_i32_17 : i32
    %41 = vector.broadcast %40 : i1 to vector<1x384xi1>
    %42 = vector.broadcast %41 : vector<1x384xi1> to vector<1x384xi1>
    %43 = arith.xori %39, %42 : vector<1x384xi1>
    %44 = arith.andi %43, %37 : vector<1x384xi1>
    %45 = vector.broadcast %33 : i32 to vector<1x384xi32>
    %46 = arith.addi %35, %45 : vector<1x384xi32>
    %47 = arith.select %44, %46, %35 : vector<1x384xi1>, vector<1x384xi32>
    %48 = arith.sitofp %47 : vector<1x384xi32> to vector<1x384xf32>
    %49 = vector.broadcast %48 : vector<1x384xf32> to vector<9x384xf32>
    %50 = arith.cmpf oeq, %30, %49 : vector<9x384xf32>
    %cst_18 = arith.constant 1.000000e+00 : f32
    %cst_19 = arith.constant 0.000000e+00 : f32
    %51 = vector.broadcast %cst_18 : f32 to vector<9x384xf32>
    %52 = vector.broadcast %cst_19 : f32 to vector<9x384xf32>
    %53 = arith.select %50, %51, %52 : vector<9x384xi1>, vector<9x384xf32>
    %54 = arith.fptosi %53 : vector<9x384xf32> to vector<9x384xi8>
    %c0_20 = arith.constant 0 : index
    %c0_21 = arith.constant 0 : index
    %55 = vector.load %arg4[%c0_20, %c0_21] : memref<9x384xi8, #tpu.memory_space<vmem>>, vector<9x384xi8>
    tpu.vector_store %arg4[%c0_20, %c0_21], %54 {strides = array<i32>} : memref<9x384xi8, #tpu.memory_space<vmem>>, vector<9x384xi8>,
    return
  }
  func.func @transform_0(%arg0: i32) -> (i32, i32) {
    %c0_i32 = arith.constant 0 : i32
    %c0_i32_0 = arith.constant 0 : i32
    %c0_i32_1 = arith.constant 0 : i32
    return %c0_i32, %c0_i32_0 : i32, i32
  }
  func.func @transform_1(%arg0: i32) -> (i32, i32) {
    %c0_i32 = arith.constant 0 : i32
    %c0_i32_0 = arith.constant 0 : i32
    %c0_i32_1 = arith.constant 0 : i32
    return %c0_i32, %c0_i32_0 : i32, i32
  }
  func.func @transform_2(%arg0: i32) -> (i32, i32) {
    %c0_i32 = arith.constant 0 : i32
    %c0_i32_0 = arith.constant 0 : i32
    return %arg0, %c0_i32 : i32, i32
  }
  func.func @transform_3(%arg0: i32) -> (i32, i32) {
    %c0_i32 = arith.constant 0 : i32
    %c0_i32_0 = arith.constant 0 : i32
    return %arg0, %c0_i32 : i32, i32
  }
}

</mosaic_0001>

<bundles_post_ra>
// kernel: _split_distance_encoding_jit.1
= control target key start
LH: loop header
LB: loop body
LE: loop exit
PB: predicated region body
PF: predicated region fallthrough
CT: control target
= control target key end

     0   :  { %v869_v47 = vmov 0.0   ;;  %vm871_vm0 = vmmov 0   ;;  %s1126_s0 = inlined_call_operand.vmem [shape: bf16[256,128], index: 0, kind: input, shape index: {}]   ;;  %s1127_s2 = inlined_call_operand.vmem [shape: s32[9,256], index: 2, kind: input, shape index: {}]   ;;  %s1128_s1 = inlined_call_operand.vmem [shape: bf16[128,384], index: 1, kind: input, shape index: {}]   ;;  %s1129_s3 = inlined_call_operand.vmem [shape: s8[9,384], index: 3, kind: output, shape index: {}]  }
   0x1   :  { %v895_v0 = vld [vmem:[%s1126_s0 + $0x78] sm:$0xff]   ;;  %v907_v2 = vld [vmem:[%s1126_s0 + $0x70] sm:$0xff]   ;;  %v921_v4 = vld [vmem:[%s1126_s0 + $0x68] sm:$0xff]  }
   0x2   :  { %v900_v1 = vld [vmem:[%s1126_s0 + $0x38] sm:$0xff]   ;;  %705 = vmatprep.subr.bf16.mxu0 %v895_v0  ;;  %727 = vmatprep.subr.bf16.mxu1 %v895_v0  ;;  %v914_v3 = vld [vmem:[%s1126_s0 + $0x30] sm:$0xff]   ;;  %v928_v5 = vld [vmem:[%s1126_s0 + $0x28] sm:$0xff]  }
   0x3   :  { %706 = vmatpush3.bf16.msra.mxu0 %v900_v1  ;;  %728 = vmatpush3.bf16.msra.mxu1 %v900_v1  ;;  %v935_v6 = vld [vmem:[%s1126_s0 + $0x60] sm:$0xff]   ;;  %v949_v8 = vld [vmem:[%s1126_s0 + $0x58] sm:$0xff]   ;;  %v831_v10 = vld [vmem:[%s1126_s0 + $0x50] sm:$0xff]  }
   0x4   :  { %707 = vmatprep.subr.bf16.mxu0 %v907_v2  ;;  %729 = vmatprep.subr.bf16.mxu1 %v907_v2  ;;  %v942_v7 = vld [vmem:[%s1126_s0 + $0x20] sm:$0xff]   ;;  %v954_v9 = vld [vmem:[%s1126_s0 + $0x18] sm:$0xff]   ;;  %v16_v11 = vld [vmem:[%s1127_s2 + $0x8] sm:$0xff] }
   0x5   :  { %v18_v12 = vld [vmem:[%s1127_s2 + $0x18] sm:$0x1]  ;;  %v15_v13 = vld [vmem:[%s1127_s2] sm:$0xff]  ;;  %v20_v14 = vcvt.s32.f32 %v16_v11  ;;  %v17_v16 = vld [vmem:[%s1127_s2 + $0x10] sm:$0x1] }
   0x6   :  { %v22_v15 = vcvt.s32.f32 %v18_v12  ;;  %v19_v17 = vcvt.s32.f32 %v15_v13  ;;  %v21_v18 = vcvt.s32.f32 %v17_v16  ;;  %v832_v19 = vld [vmem:[%s1126_s0 + $0x10] sm:$0xff]   ;;  %v833_v21 = vld [vmem:[%s1126_s0 + $0x48] sm:$0xff]   ;;  %v835_v30 = vld [vmem:[%s1126_s0 + $0x40] sm:$0xff]  }
   0x7   :  { %708 = vmatpush3.bf16.msra.mxu0 %v914_v3  ;;  %730 = vmatpush3.bf16.msra.mxu1 %v914_v3  ;;  %v834_v27 = vld [vmem:[%s1126_s0 + $0x8] sm:$0xff]   ;;  %v836_v34 = vld [vmem:[%s1126_s0] sm:$0xff]   ;;  %v840_v49 = vld [vmem:[%s1128_s1 + $0xb0] ss:$12 sps:$4 sm:$0xff]  }
   0x8   :  { %709 = vmatprep.subr.bf16.mxu0 %v921_v4  ;;  %731 = vmatprep.subr.bf16.mxu1 %v921_v4  ;;  %v24_v20 = vpack.c.bf16 %v22_v15, %v20_v14  ;;  %v23_v22 = vpack.c.bf16 %v21_v18, %v19_v17  ;;  %v837_v46 = vld [vmem:[%s1128_s1 + $0xa8] ss:$12 sps:$4 sm:$0xff]   ;;  %v839_v48 = vld [vmem:[%s1128_s1 + $0xac] ss:$12 sps:$4 sm:$0xff]   ;;  %v841_v50 = vld [vmem:[%s1128_s1 + $0x90] ss:$12 sps:$4 sm:$0xff]  }
   0x9   :  { %v843_v51 = vld [vmem:[%s1128_s1 + $0x94] ss:$12 sps:$4 sm:$0xff]   ;;  %v844_v52 = vld [vmem:[%s1128_s1 + $0x98] ss:$12 sps:$4 sm:$0xff]   ;;  %v847_v53 = vld [vmem:[%s1128_s1 + $0x7c] ss:$12 sps:$4 sm:$0xff]  }
   0xa   :  { %v26_v23 = vunpack.c.l.bf16 %v24_v20  ;;  %v28_v24 = vunpack.c.h.bf16 %v24_v20  ;;  %246 = vmatprep.mubr.bf16.mxu1 %v24_v20  ;;  %v25_v25 = vunpack.c.l.bf16 %v23_v22  ;;  %v27_v26 = vunpack.c.h.bf16 %v23_v22  ;;  %v845_v54 = vld [vmem:[%s1128_s1 + $0x78] ss:$12 sps:$4 sm:$0xff]   ;;  %v848_v55 = vld [vmem:[%s1128_s1 + $0x80] ss:$12 sps:$4 sm:$0xff]   ;;  %v852_v58 = vld [vmem:[%s1128_s1 + $0x68] ss:$12 sps:$4 sm:$0xff]  }
   0xb   :  { %710 = vmatpush3.bf16.msra.mxu0 %v928_v5  ;;  %732 = vmatpush3.bf16.msra.mxu1 %v928_v5  ;;  %v851_v56 = vld [vmem:[%s1128_s1 + $0x64] ss:$12 sps:$4 sm:$0xff]   ;;  %v849_v57 = vld [vmem:[%s1128_s1 + $0x60] ss:$12 sps:$4 sm:$0xff]   ;;  %v853_v60 = vld [vmem:[%s1128_s1 + $0x48] ss:$12 sps:$4 sm:$0xff]  }
   0xc   :  { %711 = vmatprep.subr.bf16.mxu0 %v935_v6  ;;  %733 = vmatprep.subr.bf16.mxu1 %v935_v6  ;;  %v30_v28 = vsub.f32 %v20_v14, %v26_v23  ;;  %v32_v29 = vsub.f32 %v22_v15, %v28_v24  ;;  %v29_v32 = vsub.f32 %v19_v17, %v25_v25  ;;  %v855_v59 = vld [vmem:[%s1128_s1 + $0x4c] ss:$12 sps:$4 sm:$0xff]   ;;  %v856_v61 = vld [vmem:[%s1128_s1 + $0x50] ss:$12 sps:$4 sm:$0xff]   ;;  %v859_v62 = vld [vmem:[%s1128_s1 + $0x34] ss:$12 sps:$4 sm:$0xff]  }
   0xd   :  { %v31_v33 = vsub.f32 %v21_v18, %v27_v26  ;;  %v857_v63 = vld [vmem:[%s1128_s1 + $0x30] ss:$12 sps:$4 sm:$0xff]  }
   0xe   :  { %v34_v31 = vpack.c.bf16 %v32_v29, %v30_v28 }
   0xf   :  { %712 = vmatpush3.bf16.msra.mxu0 %v942_v7  ;;  %734 = vmatpush3.bf16.msra.mxu1 %v942_v7  ;;  %v33_v39 = vpack.c.bf16 %v31_v33, %v29_v32 }
  0x10   :  { %713 = vmatprep.subr.bf16.mxu0 %v949_v8  ;;  %735 = vmatprep.subr.bf16.mxu1 %v949_v8  ;;  %v36_v35 = vunpack.c.l.bf16 %v34_v31  ;;  %v38_v36 = vunpack.c.h.bf16 %v34_v31 }
  0x11   :  { %205 = vmatprep.mubr.bf16.mxu0 %v34_v31  ;;  %v35_v41 = vunpack.c.l.bf16 %v33_v39  ;;  %v37_v42 = vunpack.c.h.bf16 %v33_v39 }
  0x12   :  { %v40_v37 = vsub.f32 %v30_v28, %v36_v35  ;;  %v42_v38 = vsub.f32 %v32_v29, %v38_v36 }
  0x13   :  { %714 = vmatpush3.bf16.msra.mxu0 %v954_v9  ;;  %736 = vmatpush3.bf16.msra.mxu1 %v954_v9  ;;  %v39_v43 = vsub.f32 %v29_v32, %v35_v41  ;;  %v41_v44 = vsub.f32 %v31_v33, %v37_v42 }
  0x14   :  { %715 = vmatprep.subr.bf16.mxu0 %v831_v10  ;;  %737 = vmatprep.subr.bf16.mxu1 %v831_v10  ;;  %v44_v40 = vpack.c.bf16 %v42_v38, %v40_v37  ;;  %v555_v37 = vlaneseq }
  0x15   :  { %v43_v45 = vpack.c.bf16 %v41_v44, %v39_v43 }
  0x16   :  { %v556_v38 = vand.u32 127, %v555_v37 }
  0x17   :  { %716 = vmatpush3.bf16.msra.mxu0 %v832_v19  ;;  %738 = vmatpush3.bf16.msra.mxu1 %v832_v19 }
  0x18   :  { %717 = vmatprep.subr.bf16.mxu0 %v833_v21  ;;  %739 = vmatprep.subr.bf16.mxu1 %v833_v21  ;;  %v1087_v41 = vmul.u32.u64.low 2863311531, %v556_v38  ;;  %v1088_v42 = vmul.u32.u64.high 2863311531, %v556_v38, %v1087_v41 }
  0x1b   :  { %718 = vmatpush3.bf16.msra.mxu0 %v834_v27  ;;  %740 = vmatpush3.bf16.msra.mxu1 %v834_v27 }
  0x1c   :  { %719 = vmatprep.subr.bf16.mxu0 %v835_v30  ;;  %741 = vmatprep.subr.bf16.mxu1 %v835_v30 }
  0x1f   :  { %720 = vmatpush3.bf16.msra.mxu0 %v836_v34  ;;  %742 = vmatpush3.bf16.msra.mxu1 %v836_v34 }
  0x20   :  { %749 = vmatprep.subr.bf16.mxu0 %v895_v0  ;;  %471 = vmatprep.subr.bf16.mxu1 %v839_v48  ;;  %v860_v0 = vld [vmem:[%s1128_s1 + $0x38] ss:$12 sps:$4 sm:$0xff]   ;;  %v565_v48 = vshrl.u32 %v1088_v42, 1 }
  0x22   :  { %206 = vmatmul.mubr.bf16.vlgmr.msra.gmra.mxu0 %v33_v39  ;;  %247 = vmatmul.mubr.bf16.vlgmr.msra.gmra.mxu1 %v23_v22  ;;  %v558_v39 = vadd.s32 256, %v556_v38 }
  0x23   :  { %750 = vmatpush3.bf16.msra.mxu0 %v900_v1  ;;  %287 = vmatprep.mubr.bf16.mxu0 %v44_v40  ;;  %v863_v1 = vld [vmem:[%s1128_s1 + $0x1c] ss:$12 sps:$4 sm:$0xff]   ;;  %v557_v40 = vadd.s32 128, %v556_v38 }
  0x24   :  { %751 = vmatprep.subr.bf16.mxu0 %v907_v2  ;;  %472 = vmatpush1.bf16.msra.mxu1 %v837_v46  ;;  %v861_v2 = vld [vmem:[%s1128_s1 + $0x18] ss:$12 sps:$4 sm:$0xff]   ;;  %v1090_v43 = vmul.u32.u64.low 2863311531, %v558_v39  ;;  %v1091_v44 = vmul.u32.u64.high 2863311531, %v558_v39, %v1090_v43 }
  0x25   :  { %473 = vmatprep.subr.bf16.mxu1 %v843_v51  ;;  %v566_v51 = vmul.u32 3, %v565_v48 }
  0x27   :  { %752 = vmatpush3.bf16.msra.mxu0 %v914_v3  ;;  %v864_v3 = vld [vmem:[%s1128_s1 + $0x20] ss:$12 sps:$4 sm:$0xff]  }
  0x28   :  { %753 = vmatprep.subr.bf16.mxu0 %v921_v4  ;;  %474 = vmatpush1.bf16.msra.mxu1 %v841_v50  ;;  %v867_v4 = vld [vmem:[%s1128_s1 + $0x4] ss:$12 sps:$4 sm:$0xff]  }
  0x29   :  { %475 = vmatprep.subr.bf16.mxu1 %v847_v53 }
  0x2b   :  { %754 = vmatpush3.bf16.msra.mxu0 %v928_v5  ;;  %v865_v5 = vld [vmem:[%s1128_s1] ss:$12 sps:$4 sm:$0xff]  }
  0x2c   :  { %755 = vmatprep.subr.bf16.mxu0 %v935_v6  ;;  %476 = vmatpush1.bf16.msra.mxu1 %v845_v54  ;;  %v868_v6 = vld [vmem:[%s1128_s1 + $0x8] ss:$12 sps:$4 sm:$0xff]   ;;  %v567_v54 = vsub.s32 %v556_v38, %v566_v51 }
  0x2d   :  { %477 = vmatprep.subr.bf16.mxu1 %v851_v56 }
  0x2e   :  { %vm592_vm5 = vcmp.ne.s32.totalorder %v567_v54, 0  ;;  %vm595_vm6 = vcmp.lt.s32.totalorder %v567_v54, 0 }
  0x2f   :  { %756 = vmatpush3.bf16.msra.mxu0 %v942_v7  ;;  %v870_v7 = vmov 0   ;;  %vm598_vm9 = vmand %vm595_vm6, %vm592_vm5  ;;  %vm648_vm5 = vsmask.f32 0  ;;  %vm650_vm6 = vcmask 1042434  }
  0x30   :  { %757 = vmatprep.subr.bf16.mxu0 %v949_v8  ;;  %478 = vmatpush1.bf16.msra.mxu1 %v849_v57  ;;  %v601_v57 = vadd.s32 3, %v567_v54 }
  0x31   :  { %479 = vmatprep.subr.bf16.mxu1 %v855_v59  ;;  %503 = vmatprep.mubr.bf16.mxu1 %v870_v7 }
  0x33   :  { %758 = vmatpush3.bf16.msra.mxu0 %v954_v9 }
  0x34   :  { %759 = vmatprep.subr.bf16.mxu0 %v831_v10  ;;  %480 = vmatpush1.bf16.msra.mxu1 %v853_v60  ;;  %v604_v60 = vsel %vm598_vm9, %v601_v57, %v567_v54 }
  0x35   :  { %481 = vmatprep.subr.bf16.mxu1 %v859_v62 }
  0x37   :  { %760 = vmatpush3.bf16.msra.mxu0 %v832_v19 }
  0x38   :  { %761 = vmatprep.subr.bf16.mxu0 %v833_v21  ;;  %482 = vmatpush1.bf16.msra.mxu1 %v857_v63  ;;  %v607_v63 = vcvt.s32.f32 %v604_v60 }
  0x39   :  { %483 = vmatprep.subr.bf16.mxu1 %v863_v1 }
  0x3b   :  { %762 = vmatpush3.bf16.msra.mxu0 %v834_v27 }
  0x3c   :  { %763 = vmatprep.subr.bf16.mxu0 %v835_v30  ;;  %484 = vmatpush1.bf16.msra.mxu1 %v861_v2 }
  0x3d   :  { %485 = vmatprep.subr.bf16.mxu1 %v867_v4 }
  0x3f   :  { %764 = vmatpush3.bf16.msra.mxu0 %v836_v34 }
  0x40   :  { %780 = vmatprep.subr.bf16.mxu0 %v869_v47  ;;  %486 = vmatpush1.bf16.msra.mxu1 %v865_v5 }
  0x42   :  { %288 = vmatmul.mubr.bf16.vlgmr.msra.gmra.mxu0 %v43_v45  ;;  %v1093_v45 = vmul.u32.u64.low 2863311531, %v557_v40  ;;  %v1094_v46 = vmul.u32.u64.high 2863311531, %v557_v40, %v1093_v45 }
  0x43   :  { %781 = vmatpush3.bf16.msra.mxu0 %v840_v49  ;;  %796 = vmatprep.mubr.msk.bf16.mxu0 %vm871_vm0, %v869_v47  ;;  %v587_v49 = vshrl.u32 %v1091_v44, 1 }
  0x44   :  { %782 = vmatprep.subr.bf16.mxu0 %v869_v47  ;;  %v576_v50 = vshrl.u32 %v1094_v46, 1  ;;  %v658_v46 = vld [vmem:[%s1129_s3 + $0x6] sm:$0x15] }
  0x46   :  { %v577_v53 = vmul.u32 3, %v576_v50 }
  0x47   :  { %783 = vmatpush3.bf16.msra.mxu0 %v844_v52  ;;  %v588_v52 = vmul.u32 3, %v587_v49 }
  0x48   :  { %784 = vmatprep.subr.bf16.mxu0 %v869_v47  ;;  %v578_v56 = vsub.s32 %v557_v40, %v577_v53 }
  0x4a   :  { %vm593_vm10 = vcmp.ne.s32.totalorder %v578_v56, 0  ;;  %vm596_vm11 = vcmp.lt.s32.totalorder %v578_v56, 0  ;;  %v602_v59 = vadd.s32 3, %v578_v56 }
  0x4b   :  { %785 = vmatpush3.bf16.msra.mxu0 %v848_v55  ;;  %v589_v55 = vsub.s32 %v558_v39, %v588_v52  ;;  %vm599_vm13 = vmand %vm596_vm11, %vm593_vm10  ;;  %vm654_vm10 = vcmask 1044484   ;;  %vm655_vm11 = vsmask.f32 4096 }
  0x4c   :  { %786 = vmatprep.subr.bf16.mxu0 %v869_v47  ;;  %v605_v62 = vsel %vm599_vm13, %v602_v59, %v578_v56  ;;  %vm656_vm13 = vmand %vm654_vm10, %vm655_vm11 }
  0x4d   :  { %vm594_vm7 = vcmp.ne.s32.totalorder %v589_v55, 0  ;;  %vm597_vm8 = vcmp.lt.s32.totalorder %v589_v55, 0  ;;  %v608_v1 = vcvt.s32.f32 %v605_v62 }
  0x4e   :  { %vm600_vm12 = vmand %vm597_vm8, %vm594_vm7  ;;  %vm651_vm7 = vsmask.f32 2048 }
  0x4f   :  { %787 = vmatpush3.bf16.msra.mxu0 %v852_v58  ;;  %v603_v58 = vadd.s32 3, %v589_v55  ;;  %vm1109_vm9 = vmand %vm650_vm6, %vm651_vm7 }
  0x50   :  { %788 = vmatprep.subr.bf16.mxu0 %v869_v47 }
  0x53   :  { %789 = vmatpush3.bf16.msra.mxu0 %v856_v61  ;;  %v606_v61 = vsel %vm600_vm12, %v603_v58, %v589_v55 }
  0x54   :  { %790 = vmatprep.subr.bf16.mxu0 %v869_v47 }
  0x57   :  { %791 = vmatpush3.bf16.msra.mxu0 %v860_v0  ;;  %v609_v0 = vcvt.s32.f32 %v606_v61 }
  0x58   :  { %792 = vmatprep.subr.bf16.mxu0 %v869_v47 }
  0x5b   :  { %793 = vmatpush3.bf16.msra.mxu0 %v864_v3 }
  0x5c   :  { %794 = vmatprep.subr.bf16.mxu0 %v869_v47 }
  0x5f   :  { %795 = vmatpush3.bf16.msra.mxu0 %v868_v6 }
  0xe2   :  { %v721_v8 = vpop.f32.mrf.mxu0  ;;  %v743_v9 = vpop.f32.mrf.mxu1 }
  0xe4   :  { %v722_v10 = vpop.f32.mrf.mxu0  ;;  %v744_v11 = vpop.f32.mrf.mxu1 }
  0xe5   :  { %v723_v15 = vadd.f32 %v722_v10, %v721_v8  ;;  %v745_v16 = vadd.f32 %v744_v11, %v743_v9 }
  0xe6   :  { %v724_v12 = vpop.f32.mrf.mxu0  ;;  %v746_v13 = vpop.f32.mrf.mxu1 }
  0xe7   :  { %v249_v20 = vadd.f32 %v745_v16, %v723_v15 }
  0xe8   :  { %v725_v14 = vpop.f32.mrf.mxu0  ;;  %v747_v17 = vpop.f32.mrf.mxu1 }
  0xe9   :  { %v726_v21 = vadd.f32 %v725_v14, %v724_v12  ;;  %v748_v22 = vadd.f32 %v747_v17, %v746_v13 }
  0xeb   :  { %v252_v27 = vadd.f32 %v748_v22, %v726_v21 }
 0x102   :  { %v765_v18 = vpop.f32.mrf.mxu0 }
 0x104   :  { %v766_v19 = vpop.f32.mrf.mxu0 }
 0x105   :  { %v767_v23 = vadd.f32 %v766_v19, %v765_v18 }
 0x106   :  { %v768_v24 = vpop.f32.mrf.mxu0 }
 0x107   :  { %v296_v25 = vadd.f32 %v767_v23, %v249_v20 }
 0x108   :  { %v769_v26 = vpop.f32.mrf.mxu0 }
 0x109   :  { %vm298_vm1 = vcmp.gt.f32.partialorder %v296_v25, 60.0  ;;  %vm304_vm2 = vcmp.gt.f32.partialorder %v296_v25, 170.0  ;;  %v770_v28 = vadd.f32 %v769_v26, %v768_v24 }
 0x10a   :  { %v300_v30 = vsel %vm298_vm1, 1.0, %v869_v47  ;;  %v306_v31 = vsel %vm304_vm2, 1.0, %v869_v47 }
 0x10b   :  { %v297_v29 = vadd.f32 %v770_v28, %v252_v27  ;;  %v308_v34 = vadd.f32 %v306_v31, %v300_v30 }
 0x10d   :  { %vm299_vm3 = vcmp.gt.f32.partialorder %v297_v29, 60.0  ;;  %vm305_vm4 = vcmp.gt.f32.partialorder %v297_v29, 170.0 }
 0x10e   :  { %v301_v32 = vsel %vm299_vm3, 1.0, %v869_v47  ;;  %v307_v33 = vsel %vm305_vm4, 1.0, %v869_v47  ;;  %vm647_vm4 = vcmask 1040384  }
 0x10f   :  { %v309_v35 = vadd.f32 %v307_v33, %v301_v32  ;;  %vm1105_vm8 = vmand %vm647_vm4, %vm648_vm5 }
 0x110   :  { %vm653_vm12 = vmor %vm1109_vm9, %vm1105_vm8 }
 0x111   :  { %v310_v36 = vpack.c.bf16 %v309_v35, %v308_v34 }
 0x113   :  { %504 = vmatmul.mubr.bf16.vlgmr.msra.gmra.mxu1 %v310_v36  ;;  %797 = vmatmul.mubr.bf16.vlgmr.msra.gmra.mxu0 %v310_v36 }
 0x1d3   :  { %v505_v2 = vpop.f32.mrf.mxu1  ;;  %v548_v3 = vpop.f32.mrf.mxu0 }
 0x1d4   :  { %vm610_vm14 = vcmp.eq.f32.partialorder %v505_v2, %v607_v63  ;;  %vm612_vm15 = vcmp.eq.f32.partialorder %v548_v3, %v609_v0 }
 0x1d5   :  { %v616_v4 = vsel %vm610_vm14, 1.0, %v869_v47  ;;  %v618_v5 = vsel %vm612_vm15, 1.0, %v869_v47  ;;  %v507_v6 = vpop.f32.mrf.mxu1  ;;  %v798_v7 = vpop.f32.mrf.mxu0  ;;  %vm657_vm14 = vmor %vm656_vm13, %vm653_vm12 }
 0x1d6   :  { %v622_v8 = vmax.f32 %v616_v4, -128.0  ;;  %v624_v9 = vmax.f32 %v618_v5, -128.0  ;;  %vm611_vm0 = vcmp.eq.f32.partialorder %v507_v6, %v608_v1 }
 0x1d7   :  { %v617_v10 = vsel %vm611_vm0, 1.0, %v869_v47  ;;  %v509_v11 = vpop.f32.mrf.mxu1  ;;  %v551_v12 = vpop.f32.mrf.mxu0 }
 0x1d8   :  { %v628_v13 = vmin.f32 %v622_v8, 127.0  ;;  %v630_v14 = vmin.f32 %v624_v9, 127.0  ;;  %v623_v15 = vmax.f32 %v617_v10, -128.0  ;;  %vm613_vm1 = vcmp.eq.f32.partialorder %v509_v11, %v607_v63 }
 0x1d9   :  { %v619_v16 = vsel %vm613_vm1, 1.0, %v869_v47  ;;  %vm615_vm2 = vcmp.eq.f32.partialorder %v551_v12, %v609_v0  ;;  %v511_v17 = vpop.f32.mrf.mxu1  ;;  %v799_v18 = vpop.f32.mrf.mxu0 }
 0x1da   :  { %v806_v19 = vtrunc.f32 %v628_v13  ;;  %v810_v20 = vtrunc.f32 %v630_v14  ;;  %v629_v21 = vmin.f32 %v623_v15, 127.0  ;;  %v625_v22 = vmax.f32 %v619_v16, -128.0 }
 0x1db   :  { %v621_v23 = vsel %vm615_vm2, 1.0, %v869_v47  ;;  %vm614_vm3 = vcmp.eq.f32.partialorder %v511_v17, %v608_v1 }
 0x1dc   :  { %v811_v24 = vcvt.f32.s32 %v810_v20  ;;  %v808_v25 = vtrunc.f32 %v629_v21  ;;  %v631_v26 = vmin.f32 %v625_v22, 127.0  ;;  %v627_v27 = vmax.f32 %v621_v23, -128.0 }
 0x1dd   :  { %v620_v28 = vsel %vm614_vm3, 1.0, %v869_v47  ;;  %v807_v29 = vcvt.f32.s32 %v806_v19 }
 0x1de   :  { %v809_v30 = vcvt.f32.s32 %v808_v25  ;;  %v626_v31 = vmax.f32 %v620_v28, -128.0  ;;  %v633_v32 = vmin.f32 %v627_v27, 127.0  ;;  %v641_v34 = vpack.c.b16 %v811_v24, %v811_v24 }
 0x1df   :  { %v812_v36 = vtrunc.f32 %v631_v26 }
 0x1e0   :  { %v640_v35 = vpack.c.b16 %v809_v30, %v807_v29  ;;  %v632_v37 = vmin.f32 %v626_v31, 127.0  ;;  %v816_v39 = vtrunc.f32 %v633_v32 }
 0x1e1   :  { %v813_v42 = vcvt.f32.s32 %v812_v36 }
 0x1e2   :  { %v642_v47 = vpack.c.b8 %v641_v34, %v640_v35  ;;  %v814_v40 = vtrunc.f32 %v632_v37  ;;  %v817_v41 = vcvt.f32.s32 %v816_v39 }
 0x1e4   :  { %646 = vst [vmem:[%s1129_s3] sm:$0x3f] %v642_v47  ;;  %v815_v43 = vcvt.f32.s32 %v814_v40  ;;  %v644_v44 = vpack.c.b16 %v817_v41, %v817_v41 }
 0x1e6   :  { %v643_v45 = vpack.c.b16 %v815_v43, %v813_v42 }
 0x1e8   :  { %v645_v48 = vpack.c.b8 %v644_v44, %v643_v45 }
 0x1ea   :  { %v659_v49 = vsel %vm657_vm14, %v645_v48, %v658_v46 }
 0x1eb   :  { %660 = vst [vmem:[%s1129_s3 + $0x6] sm:$0x15] %v659_v49 }

</bundles_post_ra>
